<compile_context>
chip_gen: v7x
topology: tpu7x:2x2x1
jax: 0.10.0
libtpu: 0.0.40
codegen_flags: <defaults>
</compile_context>

<pallas_src>
import functools

import jax
import jax.numpy as jnp
from jax import lax
from jax.experimental import pallas as pl
from jax.experimental.pallas import tpu as pltpu

_LANE = 128
_MAX_TILE_HW = 16384  # caps the unrolled fold at 128 vreg-chunks per step


def _round_up(x, m):
    return ((x + m - 1) // m) * m


def _gap_kernel(x_ref, o_ref, acc_ref, *, inv_hw, tile_hw, rem):
    """Streaming global-average-pool over the HW grid axis (axis 1).

    acc_ref : (tile_rows, 128) f32 resident lane-wise partial sums.
    rem     : HW % tile_hw (static).  If nonzero, the last HW block is ragged
              and its un-DMAed (stale) tail lanes must be masked before the add.
    """
    k = pl.program_id(1)
    nk = pl.num_programs(1)

    @pl.when(k == 0)
    def _():
        acc_ref[...] = jnp.zeros_like(acc_ref)

    def fold(valid_cols):
        # VPU-only fold of the first `valid_cols` (static) columns of the block
        # into a (rows, 128) f32 partial: one vld + one vadd per input vreg.
        partial = jnp.zeros(acc_ref.shape, jnp.float32)
        full = valid_cols // _LANE
        for c in range(full):
            partial = partial + x_ref[:, c * _LANE:(c + 1) * _LANE].astype(jnp.float32)
        tail = valid_cols - full * _LANE
        if tail:
            lane = lax.broadcasted_iota(jnp.int32, acc_ref.shape, 1)
            chunk = x_ref[:, full * _LANE:(full + 1) * _LANE].astype(jnp.float32)
            partial = partial + jnp.where(lane < tail, chunk, 0.0)
        return partial

    if rem == 0:
        acc_ref[...] += fold(tile_hw)
    else:
        @pl.when(k < nk - 1)
        def _():
            acc_ref[...] += fold(tile_hw)

        @pl.when(k == nk - 1)
        def _():
            acc_ref[...] += fold(rem)

    # One amortized cross-lane (XLU) reduce + true-H*W scale + cast per tile.
    @pl.when(k == nk - 1)
    def _():
        total = jnp.sum(acc_ref[...], axis=-1, keepdims=True)  # (rows, 1)
        o_ref[...] = (total * inv_hw).astype(o_ref.dtype)


def global_avg_pool2d(x, *, tile_rows=128, block_bytes=4 * 1024 * 1024):
    """x: (N, C, H, W) -> (N, C); matches F.avg_pool2d(x, (H, W)).view(N, C)."""
    N, C, H, W = x.shape
    R, HW = N * C, H * W
    x2 = x.reshape(R, HW)

    itemsize = x2.dtype.itemsize
    sub = {4: 8, 2: 16, 1: 32}.get(itemsize, 8)  # dtype-aware sublane packing

    # Row tile: multiple of the sublane packing; prefer >=2 row blocks when the
    # rows allow it so the 'parallel' axis can shard across v7x's two TCs.
    tr = min(tile_rows, _round_up(R, sub))
    if pl.cdiv(R, tr) < 2 and R > 2 * sub:
        tr = max(sub, _round_up(pl.cdiv(R, 2), sub))

    # HW tile: ~block_bytes per block (amortizes per-grid-step overhead while
    # 2x double-buffered blocks stay within v5e/v6e/v7x scoped VMEM); take a
    # single HW block whenever the lane-rounded row fits the budget.
    budget_cols = (block_bytes // (tr * itemsize)) // _LANE * _LANE
    budget_cols = max(_LANE, min(budget_cols, _MAX_TILE_HW))
    hw_128 = _round_up(HW, _LANE)
    thw = hw_128 if hw_128 <= budget_cols else budget_cols

    grid = (pl.cdiv(R, tr), pl.cdiv(HW, thw))
    kernel = functools.partial(
        _gap_kernel,
        inv_hw=1.0 / float(HW),  # true H*W; masked tail lanes are sum-neutral
        tile_hw=thw,
        rem=HW % thw,
    )

    out = pl.pallas_call(
        kernel,
        out_shape=jax.ShapeDtypeStruct((R, 1), x.dtype),
        grid=grid,
        in_specs=[pl.BlockSpec((tr, thw), lambda r, k: (r, k))],
        out_specs=pl.BlockSpec((tr, 1), lambda r, k: (r, 0)),
        scratch_shapes=[pltpu.VMEM((tr, _LANE), jnp.float32)],
        compiler_params=pltpu.CompilerParams(
            dimension_semantics=("parallel", "arbitrary"),
            vmem_limit_bytes=32 * 1024 * 1024),
    )(x2)

    return out[:, 0].reshape(N, C)


if __name__ == "__main__":
    # Spec-sized input: N=2, C=4, H=W=16 (HW=256 -> single lane-aligned block).
    x = jax.random.normal(jax.random.PRNGKey(0), (2, 4, 16, 16), dtype=jnp.float32)
    y = jax.block_until_ready(global_avg_pool2d(x))
    ref = jnp.mean(x, axis=(2, 3))
    assert y.shape == (2, 4)
    assert jnp.allclose(y, ref, atol=1e-5, rtol=1e-5)

    # Ragged HW (49) + ragged rows (6): exercises the in-kernel tail lane mask
    # and the partial row block (no wrapper-side padding anywhere).
    x2 = jax.random.normal(jax.random.PRNGKey(1), (2, 3, 7, 7), dtype=jnp.float32)
    y2 = jax.block_until_ready(global_avg_pool2d(x2))
    assert jnp.allclose(y2, jnp.mean(x2, axis=(2, 3)), atol=1e-5, rtol=1e-5)

    # Multi-step HW reduction with ragged tail (HW=360 over 128-wide blocks) and
    # two row blocks: exercises the resident accumulator + tail-mask path.
    x3 = jax.random.normal(jax.random.PRNGKey(2), (3, 5, 18, 20), dtype=jnp.float32)
    y3 = jax.block_until_ready(
        global_avg_pool2d(x3, tile_rows=8, block_bytes=8 * 4 * 128))
    assert jnp.allclose(y3, jnp.mean(x3, axis=(2, 3)), atol=1e-5, rtol=1e-5)

    # bf16 path: exercises the dtype-aware (16-row) sublane rounding.
    x4 = jax.random.normal(jax.random.PRNGKey(3), (2, 4, 16, 16), dtype=jnp.bfloat16)
    y4 = jax.block_until_ready(global_avg_pool2d(x4))
    ref4 = jnp.mean(x4.astype(jnp.float32), axis=(2, 3))
    assert jnp.allclose(y4.astype(jnp.float32), ref4, atol=2e-2, rtol=2e-2)

    print("KERNEL_OK")
</pallas_src>

<mosaic_0001>
module attributes {stable_mosaic.version = 11 : i64} {
  func.func @_gap_kernel(%arg0: i32, %arg1: i32, %arg2: memref<8x256xf32, #tpu.memory_space<vmem>>, %arg3: memref<8x1xf32, #tpu.memory_space<vmem>>, %arg4: memref<8x128xf32, #tpu.memory_space<vmem>>) attributes {dimension_semantics = [#tpu.dimension_semantics<parallel>, #tpu.dimension_semantics<arbitrary>], iteration_bounds = array<i64: 1, 1>, scalar_prefetch = 0 : i64, scratch_operands = 1 : i64, tpu.core_type = #tpu.core_type<tc>, window_params = [{transform_indices = @transform_0, window_bounds = array<i64: 8, 256>}, {transform_indices = @transform_1, window_bounds = array<i64: 8, 1>}]} {
    %c0_i32 = arith.constant 0 : i32
    %0 = arith.cmpi eq, %arg1, %c0_i32 : i32
    %1 = arith.extui %0 : i1 to i32
    %c0_i32_0 = arith.constant 0 : i32
    %2 = arith.cmpi ne, %1, %c0_i32_0 : i32
    scf.if %2 {
      %cst_9 = arith.constant 0.000000e+00 : f32
      %14 = vector.broadcast %cst_9 : f32 to vector<8x128xf32>
      %c0_10 = arith.constant 0 : index
      %c0_11 = arith.constant 0 : index
      %15 = vector.load %arg4[%c0_10, %c0_11] : memref<8x128xf32, #tpu.memory_space<vmem>>, vector<8x128xf32>
      tpu.vector_store %arg4[%c0_10, %c0_11], %14 {strides = array<i32>} : memref<8x128xf32, #tpu.memory_space<vmem>>, vector<8x128xf32>,
    } else {
    }
    %c0 = arith.constant 0 : index
    %c0_1 = arith.constant 0 : index
    %3 = vector.load %arg4[%c0, %c0_1] : memref<8x128xf32, #tpu.memory_space<vmem>>, vector<8x128xf32>
    %cst = arith.constant 0.000000e+00 : f32
    %4 = vector.broadcast %cst : f32 to vector<8x128xf32>
    %c0_2 = arith.constant 0 : index
    %c0_3 = arith.constant 0 : index
    %5 = vector.load %arg2[%c0_2, %c0_3] : memref<8x256xf32, #tpu.memory_space<vmem>>, vector<8x128xf32>
    %6 = arith.addf %4, %5 : vector<8x128xf32>
    %c0_4 = arith.constant 0 : index
    %c128 = arith.constant 128 : index
    %7 = vector.load %arg2[%c0_4, %c128] : memref<8x256xf32, #tpu.memory_space<vmem>>, vector<8x128xf32>
    %8 = arith.addf %6, %7 : vector<8x128xf32>
    %9 = arith.addf %3, %8 : vector<8x128xf32>
    %c0_5 = arith.constant 0 : index
    %c0_6 = arith.constant 0 : index
    %10 = vector.load %arg4[%c0_5, %c0_6] : memref<8x128xf32, #tpu.memory_space<vmem>>, vector<8x128xf32>
    tpu.vector_store %arg4[%c0_5, %c0_6], %9 {strides = array<i32>} : memref<8x128xf32, #tpu.memory_space<vmem>>, vector<8x128xf32>,
    %c0_i32_7 = arith.constant 0 : i32
    %11 = arith.cmpi eq, %arg1, %c0_i32_7 : i32
    %12 = arith.extui %11 : i1 to i32
    %c0_i32_8 = arith.constant 0 : i32
    %13 = arith.cmpi ne, %12, %c0_i32_8 : i32
    scf.if %13 {
      %c0_9 = arith.constant 0 : index
      %c0_10 = arith.constant 0 : index
      %14 = vector.load %arg4[%c0_9, %c0_10] : memref<8x128xf32, #tpu.memory_space<vmem>>, vector<8x128xf32>
      %cst_11 = arith.constant dense<0.000000e+00> : vector<8xf32>
      %15 = vector.multi_reduction <add>, %14, %cst_11 [1] : vector<8x128xf32> to vector<8xf32>
      %16 = vector.shape_cast %15 : vector<8xf32> to vector<8x1xf32>
      %cst_12 = arith.constant 3.906250e-03 : f32
      %17 = vector.broadcast %cst_12 : f32 to vector<8x1xf32>
      %18 = arith.mulf %16, %17 : vector<8x1xf32>
      %c0_13 = arith.constant 0 : index
      %c0_14 = arith.constant 0 : index
      %19 = vector.load %arg3[%c0_13, %c0_14] : memref<8x1xf32, #tpu.memory_space<vmem>>, vector<8x1xf32>
      tpu.vector_store %arg3[%c0_13, %c0_14], %18 {strides = array<i32>} : memref<8x1xf32, #tpu.memory_space<vmem>>, vector<8x1xf32>,
    } else {
    }
    return
  }
  func.func @transform_0(%arg0: i32, %arg1: i32) -> (i32, i32) {
    %c0_i32 = arith.constant 0 : i32
    return %arg0, %arg1 : i32, i32
  }
  func.func @transform_1(%arg0: i32, %arg1: i32) -> (i32, i32) {
    %c0_i32 = arith.constant 0 : i32
    %c0_i32_0 = arith.constant 0 : i32
    return %arg0, %c0_i32 : i32, i32
  }
}

</mosaic_0001>

<bundles_post_ra>
// kernel: tpu_custom_call.1
= control target key start
LH: loop header
LB: loop body
LE: loop exit
PB: predicated region body
PF: predicated region fallthrough
CT: control target
= control target key end

     0   :  { %6 = vsyncpa [#allocation4], 0  ;;  %s71_s6 = smov [#allocation3]   ;;  %s97_s0 = inlined_call_operand.hbm [shape: f32[8,256], index: 0, kind: input, shape index: {}]   ;;  %s98_s1 = inlined_call_operand.vmem [shape: f32[8,1], index: 1, kind: output, shape index: {}]  }
   0x1   :  { %s13_s7 = sshll.u32 %s71_s6, 4  ;;  %s47_s10 = scalar_lea.hbm %s97_s0, 256  ;;  %s14_s7 = int_to_ptr.vmem [resolvable:$true] %s13_s7 }
   0x2   :  { %p48_p0 = scmp.ne.s32.totalorder %s97_s0, %s47_s10  ;;  %p51_p1 = scmp.lt.u32.totalorder %s47_s10, %s97_s0 }
   0x4   :  { %p53_p2 = pnand %p51_p1, %p48_p0 }
   0x6   :  { %56 = shalt.err (!%p53_p2)
}
   0x7   :  { %s57_s15 = scalar_lea.vmem %s14_s7, 256  ;;  %p62_p4 = scmp.lt.s32.totalorder %s14_s7, %s14_s7 }
   0x8   :  { %p58_p3 = scmp.ne.s32.totalorder %s14_s7, %s57_s15  ;;  %p63_p5 = scmp.lt.s32.totalorder %s57_s15, %s57_s15 }
   0xa   :  { %p64_p6 = por %p63_p5, %p62_p4 }
   0xc   :  { %p65_p7 = pnand %p64_p6, %p58_p3 }
   0xe   :  { %68 = shalt.err (!%p65_p7)
}
   0xf   :  { %16 = dma.hbm_to_vmem [thread:$0]  %s97_s0, 256, %s14_s7, [#allocation4]  }
  0x10   :  { %69 = dma.done.wait [#allocation4], 256  }
  0x11   :  { %70 = vsyncadd [#allocation4], 4294967040  ;;  %v26_v0 = vld [vmem:[#allocation3] sm:$0xff]  ;;  %v28_v1 = vld [vmem:[#allocation3 + $0x8] sm:$0xff]  ;;  %vm39_vm0 = vcmask 7168  }
  0x12   :  { %v29_v2 = vadd.f32 %v28_v1, %v26_v0 }
  0x14   :  { %36 = vadd.xlane.f32.xlu0 %v29_v2 }
  0xa1   :  { %v37_v3 = vpop.xlane.xlu0 %36 }
  0xa2   :  { %v38_v4 = vmul.f32 0.00390625, %v37_v3 }
  0xa4   :  { %40 = vst.msk [vmem:[%s98_s1] sm:$0xff] %vm39_vm0, %v38_v4 }
  0xa5   :  { %45 = vsyncpa [#allocation4], 1 }

</bundles_post_ra>
